<compile_context>
chip_gen: v6e
topology: v6e:2x2x1
jax: 0.10.0
libtpu: 0.0.40
codegen_flags: <defaults>
</compile_context>

<pallas_src>
import functools

import jax
import jax.numpy as jnp
from jax.experimental import pallas as pl
from jax.experimental.pallas import tpu as pltpu


_LANE = 128  # TPU lane width; folded output is padded to this many columns.


def _round_up(n, m):
    return (n + m - 1) // m * m


def _cdiv(a, b):
    return -(-a // b)


def _mlp_kernel(x_ref, w_ref, b_ref, o_ref):
    # Single bf16 MXU matmul, f32 accumulation, f32 bias add, bf16 lane-dense store.
    h = jnp.dot(x_ref[...].astype(jnp.bfloat16), w_ref[...],
                preferred_element_type=jnp.float32) + b_ref[...]
    o_ref[...] = h.astype(o_ref.dtype)


@functools.partial(jax.jit, static_argnames=("block_b",))
def mlp_forward(x, folded_params, block_b=512):
    """x: (B, input_size), f32 or bf16.

    folded_params: output of prepare_params() -- (W (D, 128) bf16, b (1, 128) f32),
    where only column 0 is real (columns 1..127 are zero padding).
    block_b: max rows per grid step (512 works well on v5e/v6e/v7x).
    """
    w_fold, b_fold = folded_params
    B, D = x.shape
    assert w_fold.shape == (D, _LANE) and b_fold.shape == (1, _LANE)

    # Padding policy: split B as evenly as possible over n_steps, rounded to the
    # 8-row sublane granule, instead of padding B up to a multiple of block_b.
    n_steps = _cdiv(B, block_b)
    if n_steps == 1 and B >= 16:
        n_steps = 2  # v7x megacore: give both TensorCores a grid step to chew on.
    bb = _round_up(_cdiv(B, n_steps), 8)
    b_pad = n_steps * bb
    if b_pad != B:
        x = jnp.pad(x, ((0, b_pad - B), (0, 0)))

    out = pl.pallas_call(
        _mlp_kernel,
        # bf16 output halves writeback HBM traffic; upcast/slice in the wrapper.
        out_shape=jax.ShapeDtypeStruct((b_pad, _LANE), jnp.bfloat16),
        grid_spec=pltpu.PrefetchScalarGridSpec(
            num_scalar_prefetch=0,
            grid=(n_steps,),
            in_specs=[
                pl.BlockSpec((bb, D), lambda i: (i, 0)),           # batch-tiled input
                pl.BlockSpec(w_fold.shape, lambda i: (0, 0)),      # VMEM-resident weight
                pl.BlockSpec(b_fold.shape, lambda i: (0, 0)),      # VMEM-resident bias
            ],
            out_specs=pl.BlockSpec((bb, _LANE), lambda i: (i, 0)),
        ),
        compiler_params=pltpu.CompilerParams(
            # Batch steps are independent -> shard across TensorCores on v7x megacore.
            dimension_semantics=("parallel",),
            # Working set at bb=512: 2x1.5 MiB input + 2x0.2 MiB weights + 2x0.13 MiB
            # output ~= 3.7 MiB.  32 MiB leaves ample headroom even on v7x (64 MiB).
            vmem_limit_bytes=32 << 20,
        ),
    )(x, w_fold, b_fold)

    # Drop batch padding and the 127 zero lanes of the folded output; return f32.
    return out[:B, :1].astype(jnp.float32)


def init_params(input_size, key):
    """Synthetic nn.Linear-style params (torch layout: weight (out, in), bias (out,)), f32."""
    sizes = [(input_size, 1024), (1024, 128), (128, 64), (64, 16), (16, 1)]
    params = []
    for fan_in, fan_out in sizes:
        key, kw, kb = jax.random.split(key, 3)
        bound = 1.0 / jnp.sqrt(fan_in)
        w = jax.random.uniform(kw, (fan_out, fan_in), jnp.float32, -bound, bound)
        b = jax.random.uniform(kb, (fan_out,), jnp.float32, -bound, bound)
        params.append((w, b))
    return params


def prepare_params(torch_params):
    """Torch-layout f32 params -> folded kernel params.

    Folds all five Linears (exact in eval mode: dropout is identity and there is
    no nonlinearity anywhere) into a single (D, 1) weight + (1,) bias in f32,
    zero-pads to 128 output lanes, and casts the weight to bf16 (bias stays f32).
    """
    w_fold = torch_params[0][0].T.astype(jnp.float32)          # (D, 1024)
    b_fold = torch_params[0][1].astype(jnp.float32)            # (1024,)
    for w, b in torch_params[1:]:
        w = w.astype(jnp.float32)
        w_fold = w_fold @ w.T                                   # (D, out)
        b_fold = b_fold @ w.T + b.astype(jnp.float32)           # (out,)
    # w_fold: (D, 1), b_fold: (1,)
    w_fold = jnp.pad(w_fold, ((0, 0), (0, _LANE - w_fold.shape[1])))
    b_fold = jnp.pad(b_fold.reshape(1, -1), ((0, 0), (0, _LANE - b_fold.shape[0])))
    return w_fold.astype(jnp.bfloat16), b_fold


def reference_forward_f32(x, torch_params):
    """Faithful f32 layered reference (dropout = identity in eval mode)."""
    h = x
    for (w, b) in torch_params:
        h = h @ w.T + b
    return h


def reference_forward_folded_bf16(x, folded_params):
    """Reference using exactly the kernel's folded bf16 / f32-accumulate arithmetic."""
    w, b = folded_params
    h = jnp.dot(x.astype(jnp.bfloat16), w, preferred_element_type=jnp.float32) + b
    # Mirror the kernel's bf16 output store + wrapper upcast.
    return h[:, :1].astype(jnp.bfloat16).astype(jnp.float32)


if __name__ == "__main__":
    key = jax.random.PRNGKey(0)
    key, kx = jax.random.split(key)

    input_size = 768   # CLIP ViT-L/14 embedding size used by the aesthetic predictor
    batch = 300        # not a multiple of block_b: exercises padding + the >=2-step grid
    x = jax.random.normal(kx, (batch, input_size), jnp.float32)

    torch_params = init_params(input_size, key)
    folded = prepare_params(torch_params)

    out = mlp_forward(x, folded, block_b=512)
    out = jax.block_until_ready(out)
    assert out.shape == (batch, 1)

    # Tight check against a JAX reference with identical folded bf16/f32 arithmetic.
    ref_bf16 = reference_forward_folded_bf16(x, folded)
    assert jnp.allclose(out, ref_bf16, atol=5e-3, rtol=5e-3), "mismatch vs folded bf16 reference"

    # Looser check against the faithful f32 layered reference (tolerance widened
    # because the folded weight is stored in bf16 and the output is stored in bf16).
    ref_f32 = reference_forward_f32(x, torch_params)
    assert jnp.allclose(out, ref_f32, atol=5e-2, rtol=5e-2), "mismatch vs f32 layered reference"

    print("KERNEL_OK")
</pallas_src>

<mosaic_0001>
module attributes {stable_mosaic.version = 11 : i64} {
  func.func @_mlp_kernel(%arg0: i32, %arg1: memref<152x768xf32, #tpu.memory_space<vmem>>, %arg2: memref<768x128xbf16, #tpu.memory_space<vmem>>, %arg3: memref<1x128xf32, #tpu.memory_space<vmem>>, %arg4: memref<152x128xbf16, #tpu.memory_space<vmem>>) attributes {dimension_semantics = [#tpu.dimension_semantics<parallel>], iteration_bounds = array<i64: 2>, scalar_prefetch = 0 : i64, scratch_operands = 0 : i64, tpu.core_type = #tpu.core_type<tc>, window_params = [{transform_indices = @transform_0, window_bounds = array<i64: 152, 768>}, {pipeline_mode = #tpu.pipeline_mode<synchronous>, transform_indices = @transform_1, window_bounds = array<i64: 768, 128>}, {pipeline_mode = #tpu.pipeline_mode<synchronous>, transform_indices = @transform_2, window_bounds = array<i64: 1, 128>}, {transform_indices = @transform_3, window_bounds = array<i64: 152, 128>}]} {
    %c0 = arith.constant 0 : index
    %c0_0 = arith.constant 0 : index
    %0 = vector.load %arg1[%c0, %c0_0] : memref<152x768xf32, #tpu.memory_space<vmem>>, vector<152x768xf32>
    %1 = arith.truncf %0 : vector<152x768xf32> to vector<152x768xbf16>
    %c0_1 = arith.constant 0 : index
    %c0_2 = arith.constant 0 : index
    %2 = vector.load %arg2[%c0_1, %c0_2] : memref<768x128xbf16, #tpu.memory_space<vmem>>, vector<768x128xbf16>
    %cst = arith.constant dense<0.000000e+00> : vector<152x128xf32>
    %3 = tpu.matmul %1, %2, %cst {dimension_numbers = #tpu.dot_dimension_numbers<[1], [0], [0], [1], [0, 0, 1, 1], [], []>} : vector<152x768xbf16>, vector<768x128xbf16>, vector<152x128xf32> -> vector<152x128xf32>
    %c0_3 = arith.constant 0 : index
    %c0_4 = arith.constant 0 : index
    %4 = vector.load %arg3[%c0_3, %c0_4] : memref<1x128xf32, #tpu.memory_space<vmem>>, vector<1x128xf32>
    %5 = vector.broadcast %4 : vector<1x128xf32> to vector<152x128xf32>
    %6 = arith.addf %3, %5 : vector<152x128xf32>
    %7 = arith.truncf %6 : vector<152x128xf32> to vector<152x128xbf16>
    %c0_5 = arith.constant 0 : index
    %c0_6 = arith.constant 0 : index
    %8 = vector.load %arg4[%c0_5, %c0_6] : memref<152x128xbf16, #tpu.memory_space<vmem>>, vector<152x128xbf16>
    tpu.vector_store %arg4[%c0_5, %c0_6], %7 {strides = array<i32>} : memref<152x128xbf16, #tpu.memory_space<vmem>>, vector<152x128xbf16>,
    return
  }
  func.func @transform_0(%arg0: i32) -> (i32, i32) {
    %c0_i32 = arith.constant 0 : i32
    %c0_i32_0 = arith.constant 0 : i32
    return %arg0, %c0_i32 : i32, i32
  }
  func.func @transform_1(%arg0: i32) -> (i32, i32) {
    %c0_i32 = arith.constant 0 : i32
    %c0_i32_0 = arith.constant 0 : i32
    %c0_i32_1 = arith.constant 0 : i32
    return %c0_i32, %c0_i32_0 : i32, i32
  }
  func.func @transform_2(%arg0: i32) -> (i32, i32) {
    %c0_i32 = arith.constant 0 : i32
    %c0_i32_0 = arith.constant 0 : i32
    %c0_i32_1 = arith.constant 0 : i32
    return %c0_i32, %c0_i32_0 : i32, i32
  }
  func.func @transform_3(%arg0: i32) -> (i32, i32) {
    %c0_i32 = arith.constant 0 : i32
    %c0_i32_0 = arith.constant 0 : i32
    return %arg0, %c0_i32 : i32, i32
  }
}

</mosaic_0001>

<bundles_post_ra>
// kernel: mlp_forward.1
= control target key start
LH: loop header
LB: loop body
LE: loop exit
PB: predicated region body
PF: predicated region fallthrough
CT: control target
= control target key end

     0   :  { %s1709_s12 = smov 0   ;;  %s2089_s0 = inlined_call_operand.vmem [shape: f32[304,768], index: 0, kind: input, shape index: {}]   ;;  %s2090_s1 = inlined_call_operand.vmem [shape: bf16[768,128], index: 1, kind: input, shape index: {}]   ;;  %s2091_s2 = inlined_call_operand.vmem [shape: f32[1,128], index: 2, kind: input, shape index: {}]   ;;  %s2092_s3 = inlined_call_operand.vmem [shape: bf16[304,128], index: 3, kind: output, shape index: {}]  }
   0x1 LB: > { %s1231_s13 = sadd.s32 4294967295, %s1687_s12   ;;  %p1235_p0 = scmp.ge.s32.totalorder %s1687_s12, 1  ;;  %s1687_s12 = sphi %s1709_s12, %s13_s12  }
   0x2   : > { %p139_p1 = scmp.lt.s32.totalorder %s1687_s12, 3 }
   0x4   : > { %p140_p2 = pnand %p1235_p0, %p139_p1 }
   0x5   : > { %s164_s16 = smul.u32 (!%p140_p2), 19, %s1231_s13 }
   0x6   : > { %143 = sbr.rel (%p140_p2) target bundleno = 360 (0x168), region = 32 }
   0x7   : > { %p165_p3 = scmp.lt.s32.totalorder (!%p140_p2), %s164_s16, 37 }
   0xb   : > { %v1633_v0 = vld [vmem:[%s2090_s1 + $0x78] sm:$0xff]   ;;  %v1635_v2 = vld [vmem:[%s2090_s1 + $0x70] sm:$0xff]   ;;  %v1637_v4 = vld [vmem:[%s2090_s1 + $0x68] sm:$0xff]   ;;  %s2094_s16 = smov (!%p165_p3, %s164_s16), 37 }
   0xc   : > { %v1634_v1 = vld [vmem:[%s2090_s1 + $0x38] sm:$0xff]   ;;  %1380 = vmatprep.subr.bf16.mxu0 %v1633_v0  ;;  %1608 = vmatprep.subr.bf16.mxu1 %v1633_v0  ;;  %v1636_v3 = vld [vmem:[%s2090_s1 + $0x30] sm:$0xff]   ;;  %v1638_v5 = vld [vmem:[%s2090_s1 + $0x28] sm:$0xff]   ;;  %s1624_s29 = smul.u32 48, %s2094_s16  ;;  %s1237_s19 = sshll.u32 %s2094_s16, 2 }
   0xd   : > { %1381 = vmatpush3.bf16.msra.mxu0 %v1634_v1  ;;  %1616 = vmatpush3.bf16.msra.mxu1 %v1634_v1  ;;  %v1639_v6 = vld [vmem:[%s2090_s1 + $0x60] sm:$0xff]   ;;  %v1641_v8 = vld [vmem:[%s2090_s1 + $0x58] sm:$0xff]   ;;  %v1643_v10 = vld [vmem:[%s2090_s1 + $0x50] sm:$0xff]   ;;  %s2039_s22 = scalar_lea.vmem %s2092_s3, %s1237_s19 }
   0xe   : > { %1382 = vmatprep.subr.bf16.mxu0 %v1635_v2  ;;  %1609 = vmatprep.subr.bf16.mxu1 %v1635_v2  ;;  %v1640_v7 = vld [vmem:[%s2090_s1 + $0x20] sm:$0xff]   ;;  %s1750_s9 = scalar_lea.vmem %s2089_s0, %s1624_s29  ;;  %v1642_v9 = vld [vmem:[%s2090_s1 + $0x18] sm:$0xff]   ;;  %v1644_v17 = vld [vmem:[%s2090_s1 + $0x10] sm:$0xff]  }
   0xf   : > { %v179_v11 = vld [vmem:[%s1750_s9 + $0x8] sm:$0xff]  ;;  %v185_v12 = vld [vmem:[%s1750_s9 + $0x38] sm:$0xff]  ;;  %v1647_v20 = vld [vmem:[%s2090_s1 + $0x40] sm:$0xff]  }
  0x10   : > { %v239_v13 = vld [vmem:[%s1750_s9 + $0x1e8] sm:$0xff]  ;;  %v293_v14 = vpack.c.bf16 %v185_v12, %v179_v11  ;;  %v245_v15 = vld [vmem:[%s1750_s9 + $0x218] sm:$0xff]  ;;  %v1648_v21 = vld [vmem:[%s2090_s1] sm:$0xff]  }
  0x11   : > { %1383 = vmatpush3.bf16.msra.mxu0 %v1636_v3  ;;  %1617 = vmatpush3.bf16.msra.mxu1 %v1636_v3  ;;  %v323_v16 = vpack.c.bf16 %v245_v15, %v239_v13  ;;  %v1645_v18 = vld [vmem:[%s2090_s1 + $0x48] sm:$0xff]   ;;  %v178_v22 = vld [vmem:[%s1750_s9] sm:$0xff]  ;;  %v184_v23 = vld [vmem:[%s1750_s9 + $0x30] sm:$0xff] }
  0x12   : > { %1384 = vmatprep.subr.bf16.mxu0 %v1637_v4  ;;  %1610 = vmatprep.subr.bf16.mxu1 %v1637_v4  ;;  %v1646_v19 = vld [vmem:[%s2090_s1 + $0x8] sm:$0xff]   ;;  %v238_v24 = vld [vmem:[%s1750_s9 + $0x1e0] sm:$0xff]  ;;  %v244_v25 = vld [vmem:[%s1750_s9 + $0x210] sm:$0xff]  ;;  %v292_v33 = vpack.c.bf16 %v184_v23, %v178_v22 }
  0x13   : > { %775 = vmatprep.mubr.bf16.mxu0 %v293_v14  ;;  %815 = vmatprep.mubr.bf16.mxu1 %v323_v16  ;;  %v1649_v26 = vld [vmem:[%s2090_s1 + $0xf8] sm:$0xff]   ;;  %v191_v28 = vld [vmem:[%s1750_s9 + $0x68] sm:$0xff]  ;;  %v322_v34 = vpack.c.bf16 %v244_v25, %v238_v24  ;;  %v1653_v36 = vld [vmem:[%s2090_s1 + $0xf0] sm:$0xff]  }
  0x14   : > { %v1651_v27 = vld [vmem:[%s2090_s1 + $0x178] sm:$0xff]   ;;  %v251_v32 = vld [vmem:[%s1750_s9 + $0x248] sm:$0xff]  ;;  %v1655_v38 = vld [vmem:[%s2090_s1 + $0x170] sm:$0xff]  }
  0x15   : > { %1385 = vmatpush3.bf16.msra.mxu0 %v1638_v5  ;;  %1618 = vmatpush3.bf16.msra.mxu1 %v1638_v5  ;;  %v197_v29 = vld [vmem:[%s1750_s9 + $0x98] sm:$0xff]  ;;  %v1654_v39 = vld [vmem:[%s2090_s1 + $0xb0] sm:$0xff]   ;;  %v190_v41 = vld [vmem:[%s1750_s9 + $0x60] sm:$0xff] }
  0x16   : > { %1386 = vmatprep.subr.bf16.mxu0 %v1639_v6  ;;  %1611 = vmatprep.subr.bf16.mxu1 %v1639_v6  ;;  %v1650_v30 = vld [vmem:[%s2090_s1 + $0xb8] sm:$0xff]   ;;  %v299_v37 = vpack.c.bf16 %v197_v29, %v191_v28  ;;  %v196_v42 = vld [vmem:[%s1750_s9 + $0x90] sm:$0xff]  ;;  %v250_v43 = vld [vmem:[%s1750_s9 + $0x240] sm:$0xff] }
  0x17   : > { %v1652_v31 = vld [vmem:[%s2090_s1 + $0x138] sm:$0xff]   ;;  %v256_v44 = vld [vmem:[%s1750_s9 + $0x270] sm:$0xff]  ;;  %v1657_v46 = vld [vmem:[%s2090_s1 + $0xe8] sm:$0xff]   ;;  %v298_v52 = vpack.c.bf16 %v196_v42, %v190_v41 }
  0x18   : > { %v257_v35 = vld [vmem:[%s1750_s9 + $0x278] sm:$0xff]  ;;  %v1656_v45 = vld [vmem:[%s2090_s1 + $0x130] sm:$0xff]   ;;  %v1659_v47 = vld [vmem:[%s2090_s1 + $0x168] sm:$0xff]   ;;  %v328_v53 = vpack.c.bf16 %v256_v44, %v250_v43 }
  0x19   : > { %1387 = vmatpush3.bf16.msra.mxu0 %v1640_v7  ;;  %1619 = vmatpush3.bf16.msra.mxu1 %v1640_v7  ;;  %v329_v40 = vpack.c.bf16 %v257_v35, %v251_v32  ;;  %v203_v48 = vld [vmem:[%s1750_s9 + $0xc8] sm:$0xff]  ;;  %v209_v49 = vld [vmem:[%s1750_s9 + $0xf8] sm:$0xff]  ;;  %v1661_v58 = vld [vmem:[%s2090_s1 + $0xe0] sm:$0xff]  }
  0x1a   : > { %1388 = vmatprep.subr.bf16.mxu0 %v1641_v8  ;;  %1612 = vmatprep.subr.bf16.mxu1 %v1641_v8  ;;  %v263_v50 = vld [vmem:[%s1750_s9 + $0x2a8] sm:$0xff]  ;;  %v269_v51 = vld [vmem:[%s1750_s9 + $0x2d8] sm:$0xff]  ;;  %v305_v56 = vpack.c.bf16 %v209_v49, %v203_v48  ;;  %v202_v59 = vld [vmem:[%s1750_s9 + $0xc0] sm:$0xff] }
  0x1b   : > { %v1658_v54 = vld [vmem:[%s2090_s1 + $0xa8] sm:$0xff]   ;;  %v335_v57 = vpack.c.bf16 %v269_v51, %v263_v50  ;;  %v208_v60 = vld [vmem:[%s1750_s9 + $0xf0] sm:$0xff]  ;;  %v262_v61 = vld [vmem:[%s1750_s9 + $0x2a0] sm:$0xff] }
  0x1c   : > { %v1660_v55 = vld [vmem:[%s2090_s1 + $0x128] sm:$0xff]   ;;  %v268_v62 = vld [vmem:[%s1750_s9 + $0x2d0] sm:$0xff]  ;;  %v1662_v63 = vld [vmem:[%s2090_s1 + $0xa0] sm:$0xff]   ;;  %v304_v8 = vpack.c.bf16 %v208_v60, %v202_v59 }
  0x1d   : > { %1389 = vmatpush3.bf16.msra.mxu0 %v1642_v9  ;;  %1620 = vmatpush3.bf16.msra.mxu1 %v1642_v9  ;;  %v1663_v0 = vld [vmem:[%s2090_s1 + $0x160] sm:$0xff]   ;;  %v1665_v2 = vld [vmem:[%s2090_s1 + $0xd8] sm:$0xff]   ;;  %v215_v4 = vld [vmem:[%s1750_s9 + $0x128] sm:$0xff]  ;;  %v334_v9 = vpack.c.bf16 %v268_v62, %v262_v61 }
  0x1e   : > { %1390 = vmatprep.subr.bf16.mxu0 %v1643_v10  ;;  %1613 = vmatprep.subr.bf16.mxu1 %v1643_v10  ;;  %v1664_v1 = vld [vmem:[%s2090_s1 + $0x120] sm:$0xff]   ;;  %v1667_v3 = vld [vmem:[%s2090_s1 + $0x158] sm:$0xff]   ;;  %v275_v6 = vld [vmem:[%s1750_s9 + $0x308] sm:$0xff] }
  0x1f   : > { %v221_v5 = vld [vmem:[%s1750_s9 + $0x158] sm:$0xff]  ;;  %v1669_v14 = vld [vmem:[%s2090_s1 + $0xd0] sm:$0xff]   ;;  %v214_v15 = vld [vmem:[%s1750_s9 + $0x120] sm:$0xff] }
  0x20   : > { %v281_v7 = vld [vmem:[%s1750_s9 + $0x338] sm:$0xff]  ;;  %v311_v11 = vpack.c.bf16 %v221_v5, %v215_v4  ;;  %v220_v16 = vld [vmem:[%s1750_s9 + $0x150] sm:$0xff]  ;;  %v1673_v22 = vld [vmem:[%s2090_s1 + $0xc8] sm:$0xff]  }
  0x21   : > { %1391 = vmatpush3.bf16.msra.mxu0 %v1644_v17  ;;  %1621 = vmatpush3.bf16.msra.mxu1 %v1644_v17  ;;  %v1666_v10 = vld [vmem:[%s2090_s1 + $0x98] sm:$0xff]   ;;  %v341_v13 = vpack.c.bf16 %v281_v7, %v275_v6  ;;  %v274_v17 = vld [vmem:[%s1750_s9 + $0x300] sm:$0xff]  ;;  %v227_v23 = vld [vmem:[%s1750_s9 + $0x188] sm:$0xff] }
  0x22   : > { %1392 = vmatprep.subr.bf16.mxu0 %v1645_v18  ;;  %1614 = vmatprep.subr.bf16.mxu1 %v1645_v18  ;;  %v1668_v12 = vld [vmem:[%s2090_s1 + $0x118] sm:$0xff]   ;;  %v280_v18 = vld [vmem:[%s1750_s9 + $0x330] sm:$0xff]  ;;  %v287_v25 = vld [vmem:[%s1750_s9 + $0x368] sm:$0xff] }
  0x23   : > { %v233_v24 = vld [vmem:[%s1750_s9 + $0x1b8] sm:$0xff]  ;;  %v1674_v28 = vld [vmem:[%s2090_s1 + $0x88] sm:$0xff]   ;;  %v286_v35 = vld [vmem:[%s1750_s9 + $0x360] sm:$0xff] }
  0x24   : > { %v317_v29 = vpack.c.bf16 %v233_v24, %v227_v23  ;;  %v1676_v32 = vld [vmem:[%s2090_s1 + $0x108] sm:$0xff]   ;;  %v189_v43 = vld [vmem:[%s1750_s9 + $0x58] sm:$0xff]  ;;  %v180_v48 = vld [vmem:[%s1750_s9 + $0x10] sm:$0xff] }
  0x25   : > { %1393 = vmatpush3.bf16.msra.mxu0 %v1646_v19  ;;  %1622 = vmatpush3.bf16.msra.mxu1 %v1646_v19  ;;  %v1670_v19 = vld [vmem:[%s2090_s1 + $0x90] sm:$0xff]   ;;  %v187_v41 = vld [vmem:[%s1750_s9 + $0x48] sm:$0xff]  ;;  %v186_v49 = vld [vmem:[%s1750_s9 + $0x40] sm:$0xff] }
  0x26   : > { %1394 = vmatprep.subr.bf16.mxu0 %v1647_v20  ;;  %1615 = vmatprep.subr.bf16.mxu1 %v1647_v20  ;;  %v1671_v20 = vld [vmem:[%s2090_s1 + $0x150] sm:$0xff]   ;;  %v183_v42 = vld [vmem:[%s1750_s9 + $0x28] sm:$0xff]  ;;  %v182_v50 = vld [vmem:[%s1750_s9 + $0x20] sm:$0xff] }
  0x27   : > { %v188_v51 = vld [vmem:[%s1750_s9 + $0x50] sm:$0xff]  ;;  %v198_v61 = vld [vmem:[%s1750_s9 + $0xa0] sm:$0xff]  ;;  %v229_v24 = vld [vmem:[%s1750_s9 + $0x198] sm:$0xff] }
  0x28   : > { %v192_v60 = vld [vmem:[%s1750_s9 + $0x70] sm:$0xff]  ;;  %v194_v62 = vld [vmem:[%s1750_s9 + $0x80] sm:$0xff] }
  0x29   : > { %1395 = vmatpush3.bf16.msra.mxu0 %v1648_v21  ;;  %1623 = vmatpush3.bf16.msra.mxu1 %v1648_v21  ;;  %v1672_v21 = vld [vmem:[%s2090_s1 + $0x110] sm:$0xff]   ;;  %v300_v4 = vpack.c.bf16 %v198_v61, %v192_v60  ;;  %v265_v60 = vld [vmem:[%s1750_s9 + $0x2b8] sm:$0xff]  ;;  %v271_v61 = vld [vmem:[%s1750_s9 + $0x2e8] sm:$0xff] }
  0x2a   : > { %1456 = vmatprep.subr.bf16.mxu1 %v1649_v26  ;;  %1532 = vmatprep.subr.bf16.mxu0 %v1651_v27  ;;  %v310_v26 = vpack.c.bf16 %v220_v16, %v214_v15  ;;  %v340_v27 = vpack.c.bf16 %v280_v18, %v274_v17  ;;  %v225_v15 = vld [vmem:[%s1750_s9 + $0x178] sm:$0xff]  ;;  %v224_v23 = vld [vmem:[%s1750_s9 + $0x170] sm:$0xff] }
  0x2c   : > { %776 = vmatmul.mubr.bf16.vlgmr.msra.gmra.mxu0 %v292_v33  ;;  %816 = vmatmul.mubr.bf16.vlgmr.msra.gmra.mxu1 %v322_v34  ;;  %v226_v33 = vld [vmem:[%s1750_s9 + $0x180] sm:$0xff]  ;;  %v232_v34 = vld [vmem:[%s1750_s9 + $0x1b0] sm:$0xff] }
  0x2d   : > { %1457 = vmatpush3.bf16.msra.mxu1 %v1650_v30  ;;  %1533 = vmatpush3.bf16.msra.mxu0 %v1652_v31  ;;  %v347_v30 = vpack.c.bf16 %v287_v25, %v287_v25  ;;  %v1675_v31 = vld [vmem:[%s2090_s1 + $0x148] sm:$0xff]   ;;  %v316_v44 = vpack.c.bf16 %v232_v34, %v226_v33  ;;  %v234_v33 = vld [vmem:[%s1750_s9 + $0x1c0] sm:$0xff] }
  0x2e   : > { %1458 = vmatprep.subr.bf16.mxu1 %v1653_v36  ;;  %783 = vmatprep.mubr.bf16.mxu0 %v299_v37  ;;  %v1677_v36 = vld [vmem:[%s2090_s1 + $0xc0] sm:$0xff]   ;;  %v235_v25 = vld [vmem:[%s1750_s9 + $0x1c8] sm:$0xff] }
  0x2f   : > { %823 = vmatprep.mubr.bf16.mxu1 %v329_v40  ;;  %1534 = vmatprep.subr.bf16.mxu0 %v1655_v38  ;;  %v1678_v37 = vld [vmem:[%s2090_s1 + $0x80] sm:$0xff]   ;;  %v181_v40 = vld [vmem:[%s1750_s9 + $0x18] sm:$0xff] }
  0x30   : > { %v1679_v38 = vld [vmem:[%s2090_s1 + $0x140] sm:$0xff]  }
  0x31   : > { %1459 = vmatpush3.bf16.msra.mxu1 %v1654_v39  ;;  %1535 = vmatpush3.bf16.msra.mxu0 %v1656_v45  ;;  %v1680_v39 = vld [vmem:[%s2090_s1 + $0x100] sm:$0xff]   ;;  %v346_v45 = vpack.c.bf16 %v286_v35, %v286_v35  ;;  %v236_v35 = vld [vmem:[%s1750_s9 + $0x1d0] sm:$0xff] }
  0x32   : > { %1460 = vmatprep.subr.bf16.mxu1 %v1657_v46  ;;  %1536 = vmatprep.subr.bf16.mxu0 %v1659_v47  ;;  %v295_v46 = vpack.c.bf16 %v187_v41, %v181_v40  ;;  %v297_v47 = vpack.c.bf16 %v189_v43, %v183_v42  ;;  %v230_v34 = vld [vmem:[%s1750_s9 + $0x1a0] sm:$0xff] }
  0x33   : > { %v320_v41 = vpack.c.bf16 %v236_v35, %v230_v34 }
  0x34   : > { %784 = vmatmul.mubr.bf16.gmra.mxu0 %v298_v52  ;;  %824 = vmatmul.mubr.bf16.gmra.mxu1 %v328_v53  ;;  %v193_v52 = vld [vmem:[%s1750_s9 + $0x78] sm:$0xff]  ;;  %v199_v53 = vld [vmem:[%s1750_s9 + $0xa8] sm:$0xff] }
  0x35   : > { %1461 = vmatpush3.bf16.msra.mxu1 %v1658_v54  ;;  %1537 = vmatpush3.bf16.msra.mxu0 %v1660_v55  ;;  %v195_v54 = vld [vmem:[%s1750_s9 + $0x88] sm:$0xff]  ;;  %v201_v55 = vld [vmem:[%s1750_s9 + $0xb8] sm:$0xff] }
  0x36   : > { %791 = vmatprep.mubr.bf16.mxu0 %v305_v56  ;;  %831 = vmatprep.mubr.bf16.mxu1 %v335_v57  ;;  %v294_v56 = vpack.c.bf16 %v186_v49, %v180_v48  ;;  %v296_v57 = vpack.c.bf16 %v188_v51, %v182_v50  ;;  %v303_v59 = vpack.c.bf16 %v201_v55, %v195_v54  ;;  %v253_v48 = vld [vmem:[%s1750_s9 + $0x258] sm:$0xff]  ;;  %v259_v49 = vld [vmem:[%s1750_s9 + $0x288] sm:$0xff] }
  0x37   : > { %1462 = vmatprep.subr.bf16.mxu1 %v1661_v58  ;;  %1538 = vmatprep.subr.bf16.mxu0 %v1663_v0  ;;  %v301_v58 = vpack.c.bf16 %v199_v53, %v193_v52  ;;  %v205_v0 = vld [vmem:[%s1750_s9 + $0xd8] sm:$0xff]  ;;  %v255_v50 = vld [vmem:[%s1750_s9 + $0x268] sm:$0xff]  ;;  %v331_v54 = vpack.c.bf16 %v259_v49, %v253_v48 }
  0x38   : > { %v261_v51 = vld [vmem:[%s1750_s9 + $0x298] sm:$0xff] }
  0x39   : > { %1463 = vmatpush3.bf16.msra.mxu1 %v1662_v63  ;;  %1539 = vmatpush3.bf16.msra.mxu0 %v1664_v1  ;;  %v200_v63 = vld [vmem:[%s1750_s9 + $0xb0] sm:$0xff]  ;;  %v211_v1 = vld [vmem:[%s1750_s9 + $0x108] sm:$0xff]  ;;  %v333_v55 = vpack.c.bf16 %v261_v51, %v255_v50 }
  0x3a   : > { %1464 = vmatprep.subr.bf16.mxu1 %v1665_v2  ;;  %1540 = vmatprep.subr.bf16.mxu0 %v1667_v3  ;;  %v207_v2 = vld [vmem:[%s1750_s9 + $0xe8] sm:$0xff]  ;;  %v213_v3 = vld [vmem:[%s1750_s9 + $0x118] sm:$0xff]  ;;  %v302_v5 = vpack.c.bf16 %v200_v63, %v194_v62  ;;  %v307_v6 = vpack.c.bf16 %v211_v1, %v205_v0 }
  0x3b   : > { %v309_v7 = vpack.c.bf16 %v213_v3, %v207_v2  ;;  %v267_v62 = vld [vmem:[%s1750_s9 + $0x2c8] sm:$0xff]  ;;  %v273_v63 = vld [vmem:[%s1750_s9 + $0x2f8] sm:$0xff]  ;;  %v337_v2 = vpack.c.bf16 %v271_v61, %v265_v60 }
  0x3c   : > { %792 = vmatmul.mubr.bf16.gmra.mxu0 %v304_v8  ;;  %832 = vmatmul.mubr.bf16.gmra.mxu1 %v334_v9  ;;  %v204_v8 = vld [vmem:[%s1750_s9 + $0xd0] sm:$0xff]  ;;  %v210_v9 = vld [vmem:[%s1750_s9 + $0x100] sm:$0xff]  ;;  %v339_v3 = vpack.c.bf16 %v273_v63, %v267_v62 }
  0x3d   : > { %1465 = vmatpush3.bf16.msra.mxu1 %v1666_v10  ;;  %799 = vmatprep.mubr.bf16.mxu0 %v311_v11  ;;  %v206_v10 = vld [vmem:[%s1750_s9 + $0xe0] sm:$0xff]  ;;  %v212_v11 = vld [vmem:[%s1750_s9 + $0x110] sm:$0xff]  ;;  %v306_v16 = vpack.c.bf16 %v210_v9, %v204_v8  ;;  %v277_v8 = vld [vmem:[%s1750_s9 + $0x318] sm:$0xff] }
  0x3e   : > { %839 = vmatprep.mubr.bf16.mxu1 %v341_v13  ;;  %1541 = vmatpush3.bf16.msra.mxu0 %v1668_v12  ;;  %v217_v12 = vld [vmem:[%s1750_s9 + $0x138] sm:$0xff]  ;;  %v223_v13 = vld [vmem:[%s1750_s9 + $0x168] sm:$0xff]  ;;  %v308_v17 = vpack.c.bf16 %v212_v11, %v206_v10 }
  0x3f   : > { %1466 = vmatprep.subr.bf16.mxu1 %v1669_v14  ;;  %1542 = vmatprep.subr.bf16.mxu0 %v1671_v20  ;;  %v219_v14 = vld [vmem:[%s1750_s9 + $0x148] sm:$0xff]  ;;  %v313_v18 = vpack.c.bf16 %v223_v13, %v217_v12  ;;  %v216_v20 = vld [vmem:[%s1750_s9 + $0x130] sm:$0xff]  ;;  %v285_v11 = vld [vmem:[%s1750_s9 + $0x358] sm:$0xff] }
  0x40   : > { %v283_v9 = vld [vmem:[%s1750_s9 + $0x348] sm:$0xff] }
  0x41   : > { %1467 = vmatpush3.bf16.msra.mxu1 %v1670_v19  ;;  %v315_v19 = vpack.c.bf16 %v225_v15, %v219_v14  ;;  %v279_v10 = vld [vmem:[%s1750_s9 + $0x328] sm:$0xff]  ;;  %v343_v14 = vpack.c.bf16 %v283_v9, %v277_v8 }
  0x42   : > { %1543 = vmatpush3.bf16.msra.mxu0 %v1672_v21  ;;  %1468 = vmatprep.subr.bf16.mxu1 %v1673_v22  ;;  %v222_v21 = vld [vmem:[%s1750_s9 + $0x160] sm:$0xff]  ;;  %v345_v15 = vpack.c.bf16 %v285_v11, %v279_v10 }
  0x43   : > { %1544 = vmatprep.subr.bf16.mxu0 %v1675_v31  ;;  %v218_v22 = vld [vmem:[%s1750_s9 + $0x140] sm:$0xff] }
  0x44   : > { %800 = vmatmul.mubr.bf16.gmra.mxu0 %v310_v26  ;;  %840 = vmatmul.mubr.bf16.gmra.mxu1 %v340_v27  ;;  %v231_v26 = vld [vmem:[%s1750_s9 + $0x1a8] sm:$0xff]  ;;  %v237_v27 = vld [vmem:[%s1750_s9 + $0x1d8] sm:$0xff] }
  0x45   : > { %807 = vmatprep.mubr.bf16.mxu0 %v317_v29  ;;  %847 = vmatprep.mubr.bf16.mxu1 %v347_v30  ;;  %v314_v29 = vpack.c.bf16 %v224_v23, %v218_v22  ;;  %v319_v30 = vpack.c.bf16 %v235_v25, %v229_v24  ;;  %v321_v31 = vpack.c.bf16 %v237_v27, %v231_v26  ;;  %v288_v26 = vld [vmem:[%s1750_s9 + $0x370] sm:$0xff]  ;;  %v290_v27 = vld [vmem:[%s1750_s9 + $0x380] sm:$0xff] }
  0x46   : > { %1469 = vmatpush3.bf16.msra.mxu1 %v1674_v28  ;;  %1545 = vmatpush3.bf16.msra.mxu0 %v1676_v32  ;;  %v312_v28 = vpack.c.bf16 %v222_v21, %v216_v20  ;;  %v228_v32 = vld [vmem:[%s1750_s9 + $0x190] sm:$0xff]  ;;  %v289_v20 = vld [vmem:[%s1750_s9 + $0x378] sm:$0xff]  ;;  %v291_v21 = vld [vmem:[%s1750_s9 + $0x388] sm:$0xff] }
  0x47   : > { %1470 = vmatprep.subr.bf16.mxu1 %v1677_v36  ;;  %1546 = vmatprep.subr.bf16.mxu0 %v1679_v38  ;;  %v241_v36 = vld [vmem:[%s1750_s9 + $0x1f8] sm:$0xff]  ;;  %v243_v38 = vld [vmem:[%s1750_s9 + $0x208] sm:$0xff]  ;;  %v318_v40 = vpack.c.bf16 %v234_v33, %v228_v32  ;;  %v349_v24 = vpack.c.bf16 %v289_v20, %v289_v20  ;;  %v351_v25 = vpack.c.bf16 %v291_v21, %v291_v21 }
  0x4a   : > { %1471 = vmatpush3.bf16.msra.mxu1 %v1678_v37  ;;  %1547 = vmatpush3.bf16.msra.mxu0 %v1680_v39  ;;  %v247_v37 = vld [vmem:[%s1750_s9 + $0x228] sm:$0xff]  ;;  %v249_v39 = vld [vmem:[%s1750_s9 + $0x238] sm:$0xff] }
  0x4b   : > { %v325_v42 = vpack.c.bf16 %v247_v37, %v241_v36  ;;  %v327_v43 = vpack.c.bf16 %v249_v39, %v243_v38 }
  0x4c   : > { %808 = vmatmul.mubr.bf16.gmra.mxu0 %v316_v44  ;;  %848 = vmatmul.mubr.bf16.gmra.mxu1 %v346_v45  ;;  %v240_v44 = vld [vmem:[%s1750_s9 + $0x1f0] sm:$0xff]  ;;  %v246_v45 = vld [vmem:[%s1750_s9 + $0x220] sm:$0xff] }
  0x4d   : > { %887 = vmatprep.mubr.bf16.mxu1 %v295_v46  ;;  %999 = vmatprep.mubr.bf16.mxu0 %v297_v47  ;;  %v242_v46 = vld [vmem:[%s1750_s9 + $0x200] sm:$0xff]  ;;  %v248_v47 = vld [vmem:[%s1750_s9 + $0x230] sm:$0xff]  ;;  %v324_v52 = vpack.c.bf16 %v246_v45, %v240_v44 }
  0x4e   : > { %v326_v53 = vpack.c.bf16 %v248_v47, %v242_v46 }
  0x54   : > { %888 = vmatmul.mubr.bf16.vlgmr.msra.gmra.mxu1 %v294_v56  ;;  %1000 = vmatmul.mubr.bf16.vlgmr.msra.gmra.mxu0 %v296_v57  ;;  %v252_v56 = vld [vmem:[%s1750_s9 + $0x250] sm:$0xff]  ;;  %v258_v57 = vld [vmem:[%s1750_s9 + $0x280] sm:$0xff] }
  0x55   : > { %895 = vmatprep.mubr.bf16.mxu1 %v301_v58  ;;  %1007 = vmatprep.mubr.bf16.mxu0 %v303_v59  ;;  %v254_v58 = vld [vmem:[%s1750_s9 + $0x260] sm:$0xff]  ;;  %v260_v59 = vld [vmem:[%s1750_s9 + $0x290] sm:$0xff]  ;;  %v330_v0 = vpack.c.bf16 %v258_v57, %v252_v56 }
  0x56   : > { %v332_v1 = vpack.c.bf16 %v260_v59, %v254_v58 }
  0x5c   : > { %896 = vmatmul.mubr.bf16.gmra.mxu1 %v300_v4  ;;  %1008 = vmatmul.mubr.bf16.gmra.mxu0 %v302_v5  ;;  %v264_v4 = vld [vmem:[%s1750_s9 + $0x2b0] sm:$0xff]  ;;  %v270_v5 = vld [vmem:[%s1750_s9 + $0x2e0] sm:$0xff] }
  0x5d   : > { %903 = vmatprep.mubr.bf16.mxu1 %v307_v6  ;;  %1015 = vmatprep.mubr.bf16.mxu0 %v309_v7  ;;  %v266_v6 = vld [vmem:[%s1750_s9 + $0x2c0] sm:$0xff]  ;;  %v272_v7 = vld [vmem:[%s1750_s9 + $0x2f0] sm:$0xff]  ;;  %v336_v12 = vpack.c.bf16 %v270_v5, %v264_v4 }
  0x5e   : > { %v338_v13 = vpack.c.bf16 %v272_v7, %v266_v6 }
  0x64   : > { %904 = vmatmul.mubr.bf16.gmra.mxu1 %v306_v16  ;;  %1016 = vmatmul.mubr.bf16.gmra.mxu0 %v308_v17  ;;  %v276_v16 = vld [vmem:[%s1750_s9 + $0x310] sm:$0xff]  ;;  %v282_v17 = vld [vmem:[%s1750_s9 + $0x340] sm:$0xff] }
  0x65   : > { %911 = vmatprep.mubr.bf16.mxu1 %v313_v18  ;;  %1023 = vmatprep.mubr.bf16.mxu0 %v315_v19  ;;  %v278_v18 = vld [vmem:[%s1750_s9 + $0x320] sm:$0xff]  ;;  %v284_v19 = vld [vmem:[%s1750_s9 + $0x350] sm:$0xff]  ;;  %v342_v22 = vpack.c.bf16 %v282_v17, %v276_v16 }
  0x66   : > { %v344_v23 = vpack.c.bf16 %v284_v19, %v278_v18 }
  0x6c   : > { %912 = vmatmul.mubr.bf16.gmra.mxu1 %v312_v28  ;;  %1024 = vmatmul.mubr.bf16.gmra.mxu0 %v314_v29  ;;  %v348_v28 = vpack.c.bf16 %v288_v26, %v288_v26  ;;  %v350_v29 = vpack.c.bf16 %v290_v27, %v290_v27 }
  0x6d   : > { %919 = vmatprep.mubr.bf16.mxu1 %v319_v30  ;;  %1031 = vmatprep.mubr.bf16.mxu0 %v321_v31 }
  0x74   : > { %920 = vmatmul.mubr.bf16.gmra.mxu1 %v318_v40  ;;  %1032 = vmatmul.mubr.bf16.gmra.mxu0 %v320_v41 }
  0x75   : > { %927 = vmatprep.mubr.bf16.mxu1 %v325_v42  ;;  %1039 = vmatprep.mubr.bf16.mxu0 %v327_v43 }
  0x7c   : > { %928 = vmatmul.mubr.bf16.gmra.mxu1 %v324_v52  ;;  %1040 = vmatmul.mubr.bf16.gmra.mxu0 %v326_v53 }
  0x7d   : > { %935 = vmatprep.mubr.bf16.mxu1 %v331_v54  ;;  %1047 = vmatprep.mubr.bf16.mxu0 %v333_v55 }
  0x84   : > { %936 = vmatmul.mubr.bf16.gmra.mxu1 %v330_v0  ;;  %1048 = vmatmul.mubr.bf16.gmra.mxu0 %v332_v1  ;;  %v2010_v1 = vld [vmem:[%s2091_s2] ss:$0 sm:$0xff] }
  0x85   : > { %943 = vmatprep.mubr.bf16.mxu1 %v337_v2  ;;  %1055 = vmatprep.mubr.bf16.mxu0 %v339_v3 }
  0x8c   : > { %944 = vmatmul.mubr.bf16.gmra.mxu1 %v336_v12  ;;  %1056 = vmatmul.mubr.bf16.gmra.mxu0 %v338_v13 }
  0x8d   : > { %951 = vmatprep.mubr.bf16.mxu1 %v343_v14  ;;  %1063 = vmatprep.mubr.bf16.mxu0 %v345_v15 }
  0x94   : > { %952 = vmatmul.mubr.bf16.gmra.mxu1 %v342_v22  ;;  %1064 = vmatmul.mubr.bf16.gmra.mxu0 %v344_v23 }
  0x95   : > { %959 = vmatprep.mubr.bf16.mxu1 %v349_v24  ;;  %1071 = vmatprep.mubr.bf16.mxu0 %v351_v25 }
  0x9c   : > { %960 = vmatmul.mubr.bf16.gmra.mxu1 %v348_v28  ;;  %1072 = vmatmul.mubr.bf16.gmra.mxu0 %v350_v29 }
  0xec   : > { %v1396_v30 = vpop.f32.mrf.mxu0  ;;  %v1426_v31 = vpop.f32.mrf.mxu1 }
  0xee   : > { %v1397_v32 = vpop.f32.mrf.mxu0  ;;  %v1427_v33 = vpop.f32.mrf.mxu1 }
  0xef   : > { %v1983_v34 = vadd.f32 %v1427_v33, %v1426_v31  ;;  %v1398_v21 = vadd.f32 %v1397_v32, %v1396_v30 }
  0xf0   : > { %v1399_v35 = vpop.f32.mrf.mxu0  ;;  %v1429_v36 = vpop.f32.mrf.mxu1 }
  0xf1   : > { %v778_v28 = vadd.f32 %v1398_v21, %v2010_v1 }
  0xf2   : > { %v1400_v37 = vpop.f32.mrf.mxu0  ;;  %v1430_v38 = vpop.f32.mrf.mxu1 }
  0xf3   : > { %v1985_v39 = vadd.f32 %v1430_v38, %v1429_v36  ;;  %v1401_v24 = vadd.f32 %v1400_v37, %v1399_v35 }
  0xf4   : > { %v1402_v40 = vpop.f32.mrf.mxu0  ;;  %v1432_v41 = vpop.f32.mrf.mxu1 }
  0xf5   : > { %v781_v33 = vadd.f32 %v1401_v24, %v2010_v1 }
  0xf6   : > { %v1403_v42 = vpop.f32.mrf.mxu0  ;;  %v1433_v43 = vpop.f32.mrf.mxu1 }
  0xf7   : > { %v1987_v44 = vadd.f32 %v1433_v43, %v1432_v41 }
  0xf8   : > { %v1405_v45 = vpop.f32.mrf.mxu0  ;;  %v1435_v46 = vpop.f32.mrf.mxu1 }
  0xfa   : > { %v1406_v47 = vpop.f32.mrf.mxu0  ;;  %v1436_v48 = vpop.f32.mrf.mxu1 }
  0xfb   : > { %v1989_v49 = vadd.f32 %v1436_v48, %v1435_v46  ;;  %v1404_v46 = vadd.f32 %v1403_v42, %v1402_v40  ;;  %v1407_v37 = vadd.f32 %v1406_v47, %v1405_v45 }
  0xfc   : > { %v1991_v50 = vpop.f32.mrf.mxu0  ;;  %v1438_v51 = vpop.f32.mrf.mxu1 }
  0xfd   : > { %v786_v40 = vadd.f32 %v1404_v46, %v2010_v1 }
  0xfe   : > { %v1993_v52 = vpop.f32.mrf.mxu0  ;;  %v1439_v53 = vpop.f32.mrf.mxu1 }
  0xff   : > { %v1995_v54 = vadd.f32 %v1439_v53, %v1438_v51 }
 0x100   : > { %v1997_v55 = vpop.f32.mrf.mxu0  ;;  %v1441_v56 = vpop.f32.mrf.mxu1 }
 0x102   : > { %v1999_v57 = vpop.f32.mrf.mxu0  ;;  %v1442_v58 = vpop.f32.mrf.mxu1 }
 0x103   : > { %v2001_v59 = vadd.f32 %v1442_v58, %v1441_v56  ;;  %v1413_v21 = vadd.f32 %v1999_v57, %v1997_v55 }
 0x104   : > { %v2003_v60 = vpop.f32.mrf.mxu0  ;;  %v1444_v61 = vpop.f32.mrf.mxu1 }
 0x106   : > { %v2005_v62 = vpop.f32.mrf.mxu0  ;;  %v1445_v63 = vpop.f32.mrf.mxu1 }
 0x107   : > { %v1446_v0 = vadd.f32 %v1445_v63, %v1444_v61  ;;  %v1416_v55 = vadd.f32 %v2005_v62, %v2003_v60 }
 0x108   : > { %v2012_v2 = vpop.f32.mrf.mxu0  ;;  %v1447_v3 = vpop.f32.mrf.mxu1 }
 0x109   : > { %v2015_v4 = vadd.f32 %v1446_v0, %v2010_v1 }
 0x10a   : > { %v2017_v5 = vpop.f32.mrf.mxu0  ;;  %v1448_v6 = vpop.f32.mrf.mxu1 }
 0x10b   : > { %v1449_v7 = vadd.f32 %v1448_v6, %v1447_v3  ;;  %v789_v6 = vadd.f32 %v1407_v37, %v2010_v1 }
 0x10c   : > { %v2019_v8 = vpop.f32.mrf.mxu0  ;;  %v1450_v9 = vpop.f32.mrf.mxu1 }
 0x10d   : > { %v2022_v10 = vadd.f32 %v1449_v7, %v2010_v1 }
 0x10e   : > { %v2024_v11 = vpop.f32.mrf.mxu0  ;;  %v1451_v12 = vpop.f32.mrf.mxu1 }
 0x10f   : > { %v1452_v13 = vadd.f32 %v1451_v12, %v1450_v9  ;;  %v1410_v12 = vadd.f32 %v1993_v52, %v1991_v50  ;;  %v797_v50 = vadd.f32 %v1413_v21, %v2010_v1 }
 0x110   : > { %v2026_v14 = vpop.f32.mrf.mxu0  ;;  %v1453_v15 = vpop.f32.mrf.mxu1 }
 0x111   : > { %v2029_v16 = vadd.f32 %v1452_v13, %v2010_v1 }
 0x112   : > { %v2031_v17 = vpop.f32.mrf.mxu0  ;;  %v1454_v18 = vpop.f32.mrf.mxu1 }
 0x114   : > { %v1472_v19 = vpop.f32.mrf.mxu1  ;;  %v1548_v20 = vpop.f32.mrf.mxu0 }
 0x116   : > { %v1473_v22 = vpop.f32.mrf.mxu1  ;;  %v1549_v23 = vpop.f32.mrf.mxu0 }
 0x117   : > { %v1474_v25 = vadd.f32 %v1473_v22, %v1472_v19  ;;  %v1550_v48 = vadd.f32 %v1549_v23, %v1548_v20 }
 0x118   : > { %v1475_v26 = vpop.f32.mrf.mxu1  ;;  %v1551_v27 = vpop.f32.mrf.mxu0 }
 0x119   : > { %v890_v36 = vadd.f32 %v1474_v25, %v778_v28 }
 0x11a   : > { %v1476_v29 = vpop.f32.mrf.mxu1  ;;  %v1552_v31 = vpop.f32.mrf.mxu0 }
 0x11b   : > { %v1477_v38 = vadd.f32 %v1476_v29, %v1475_v26  ;;  %v1553_v32 = vadd.f32 %v1552_v31, %v1551_v27  ;;  %v1002_v53 = vadd.f32 %v1550_v48, %v890_v36  ;;  %v794_v27 = vadd.f32 %v1410_v12, %v2010_v1 }
 0x11c   : > { %v1478_v41 = vpop.f32.mrf.mxu1  ;;  %v1554_v43 = vpop.f32.mrf.mxu0 }
 0x11d   : > { %v893_v30 = vadd.f32 %v1477_v38, %v781_v33 }
 0x11e   : > { %v1479_v51 = vpop.f32.mrf.mxu1  ;;  %v1555_v35 = vpop.f32.mrf.mxu0 }
 0x11f   : > { %v1005_v56 = vadd.f32 %v1553_v32, %v893_v30  ;;  %v1480_v58 = vadd.f32 %v1479_v51, %v1478_v41  ;;  %v1556_v13 = vadd.f32 %v1555_v35, %v1554_v43  ;;  %v1419_v30 = vadd.f32 %v2017_v5, %v2012_v2 }
 0x120   : > { %v1481_v61 = vpop.f32.mrf.mxu1  ;;  %v1557_v63 = vpop.f32.mrf.mxu0  ;;  %v1422_v2 = vadd.f32 %v2024_v11, %v2019_v8 }
 0x121   : > { %v1330_v42 = vpack.c.bf16 %v1005_v56, %v1002_v53  ;;  %v898_v45 = vadd.f32 %v1480_v58, %v786_v40  ;;  %v802_v56 = vadd.f32 %v1416_v55, %v2010_v1  ;;  %v805_v60 = vadd.f32 %v1419_v30, %v2010_v1 }
 0x122   : > { %v1482_v0 = vpop.f32.mrf.mxu1  ;;  %v1558_v3 = vpop.f32.mrf.mxu0 }
 0x123   : > { %1331 = vst [vmem:[%s2039_s22] sm:$0xff] %v1330_v42   ;;  %v1483_v47 = vadd.f32 %v1482_v0, %v1481_v61  ;;  %v1559_v18 = vadd.f32 %v1558_v3, %v1557_v63  ;;  %v1010_v22 = vadd.f32 %v1556_v13, %v898_v45 }
 0x124   : > { %v1484_v7 = vpop.f32.mrf.mxu1  ;;  %v1560_v9 = vpop.f32.mrf.mxu0 }
 0x125   : > { %v901_v15 = vadd.f32 %v1483_v47, %v789_v6 }
 0x126   : > { %v1485_v19 = vpop.f32.mrf.mxu1  ;;  %v1561_v20 = vpop.f32.mrf.mxu0 }
 0x127   : > { %v1013_v23 = vadd.f32 %v1559_v18, %v901_v15  ;;  %v1486_v24 = vadd.f32 %v1485_v19, %v1484_v7  ;;  %v1562_v57 = vadd.f32 %v1561_v20, %v1560_v9  ;;  %v1425_v7 = vadd.f32 %v2031_v17, %v2026_v14 }
 0x128   : > { %v1487_v25 = vpop.f32.mrf.mxu1  ;;  %v1563_v26 = vpop.f32.mrf.mxu0  ;;  %v810_v19 = vadd.f32 %v1422_v2, %v2010_v1 }
 0x129   : > { %v1335_v28 = vpack.c.bf16 %v1013_v23, %v1010_v22  ;;  %v906_v52 = vadd.f32 %v1486_v24, %v794_v27  ;;  %v813_v8 = vadd.f32 %v1425_v7, %v2010_v1 }
 0x12a   : > { %v1488_v29 = vpop.f32.mrf.mxu1  ;;  %v1564_v31 = vpop.f32.mrf.mxu0 }
 0x12b   : > { %1372 = vst [vmem:[%s2039_s22 + $0x8] sm:$0xff] %v1335_v28   ;;  %v1489_v33 = vadd.f32 %v1488_v29, %v1487_v25  ;;  %v1565_v43 = vadd.f32 %v1564_v31, %v1563_v26  ;;  %v1018_v32 = vadd.f32 %v1562_v57, %v906_v52 }
 0x12c   : > { %v1490_v36 = vpop.f32.mrf.mxu1  ;;  %v1566_v38 = vpop.f32.mrf.mxu0 }
 0x12d   : > { %v909_v41 = vadd.f32 %v1489_v33, %v797_v50 }
 0x12e   : > { %v1491_v46 = vpop.f32.mrf.mxu1  ;;  %v1567_v48 = vpop.f32.mrf.mxu0 }
 0x12f   : > { %v1021_v51 = vadd.f32 %v1565_v43, %v909_v41  ;;  %v1492_v35 = vadd.f32 %v1491_v46, %v1490_v36  ;;  %v1568_v5 = vadd.f32 %v1567_v48, %v1566_v38  ;;  %v818_v36 = vadd.f32 %v1983_v34, %v2010_v1 }
 0x130   : > { %v1493_v37 = vpop.f32.mrf.mxu1  ;;  %v1569_v53 = vpop.f32.mrf.mxu0  ;;  %v821_v41 = vadd.f32 %v1985_v39, %v2010_v1 }
 0x131   : > { %v1340_v58 = vpack.c.bf16 %v1021_v51, %v1018_v32  ;;  %v914_v62 = vadd.f32 %v1492_v35, %v802_v56 }
 0x132   : > { %v1494_v61 = vpop.f32.mrf.mxu1  ;;  %v1570_v63 = vpop.f32.mrf.mxu0 }
 0x133   : > { %1373 = vst [vmem:[%s2039_s22 + $0x10] sm:$0xff] %v1340_v58   ;;  %v1495_v40 = vadd.f32 %v1494_v61, %v1493_v37  ;;  %v1571_v6 = vadd.f32 %v1570_v63, %v1569_v53  ;;  %v1026_v9 = vadd.f32 %v1568_v5, %v914_v62 }
 0x134   : > { %v1496_v42 = vpop.f32.mrf.mxu1  ;;  %v1572_v0 = vpop.f32.mrf.mxu0 }
 0x135   : > { %v917_v3 = vadd.f32 %v1495_v40, %v805_v60  ;;  %v826_v60 = vadd.f32 %v1987_v44, %v2010_v1 }
 0x136   : > { %v1497_v45 = vpop.f32.mrf.mxu1  ;;  %v1573_v47 = vpop.f32.mrf.mxu0 }
 0x137   : > { %v1029_v12 = vadd.f32 %v1571_v6, %v917_v3  ;;  %v1498_v13 = vadd.f32 %v1497_v45, %v1496_v42  ;;  %v1574_v26 = vadd.f32 %v1573_v47, %v1572_v0  ;;  %v829_v42 = vadd.f32 %v1989_v49, %v2010_v1 }
 0x138   : > { %v1499_v15 = vpop.f32.mrf.mxu1  ;;  %v1575_v18 = vpop.f32.mrf.mxu0 }
 0x139   : > { %v1345_v20 = vpack.c.bf16 %v1029_v12, %v1026_v9  ;;  %v922_v11 = vadd.f32 %v1498_v13, %v810_v19  ;;  %v834_v19 = vadd.f32 %v1995_v54, %v2010_v1 }
 0x13a   : > { %v1500_v21 = vpop.f32.mrf.mxu1  ;;  %v1576_v22 = vpop.f32.mrf.mxu0 }
 0x13b   : > { %1374 = vst [vmem:[%s2039_s22 + $0x18] sm:$0xff] %v1345_v20   ;;  %v1501_v23 = vadd.f32 %v1500_v21, %v1499_v15  ;;  %v1577_v17 = vadd.f32 %v1576_v22, %v1575_v18  ;;  %v1034_v29 = vadd.f32 %v1574_v26, %v922_v11  ;;  %v837_v22 = vadd.f32 %v2001_v59, %v2010_v1 }
 0x13c   : > { %v1502_v24 = vpop.f32.mrf.mxu1  ;;  %v1578_v25 = vpop.f32.mrf.mxu0 }
 0x13d   : > { %v925_v14 = vadd.f32 %v1501_v23, %v813_v8 }
 0x13e   : > { %v1503_v27 = vpop.f32.mrf.mxu1  ;;  %v1579_v28 = vpop.f32.mrf.mxu0 }
 0x13f   : > { %v1037_v31 = vadd.f32 %v1577_v17, %v925_v14  ;;  %v1504_v50 = vadd.f32 %v1503_v27, %v1502_v24  ;;  %v1580_v32 = vadd.f32 %v1579_v28, %v1578_v25 }
 0x140   : > { %v1505_v52 = vpop.f32.mrf.mxu1  ;;  %v1581_v33 = vpop.f32.mrf.mxu0 }
 0x141   : > { %v1350_v38 = vpack.c.bf16 %v1037_v31, %v1034_v29  ;;  %v930_v43 = vadd.f32 %v1504_v50, %v818_v36 }
 0x142   : > { %v1506_v55 = vpop.f32.mrf.mxu1  ;;  %v1582_v57 = vpop.f32.mrf.mxu0 }
 0x143   : > { %1375 = vst [vmem:[%s2039_s22 + $0x20] sm:$0xff] %v1350_v38   ;;  %v1507_v46 = vadd.f32 %v1506_v55, %v1505_v52  ;;  %v1583_v35 = vadd.f32 %v1582_v57, %v1581_v33  ;;  %v1042_v56 = vadd.f32 %v1580_v32, %v930_v43 }
 0x144   : > { %v1508_v48 = vpop.f32.mrf.mxu1  ;;  %v1584_v30 = vpop.f32.mrf.mxu0 }
 0x145   : > { %v933_v51 = vadd.f32 %v1507_v46, %v821_v41 }
 0x146   : > { %v1509_v37 = vpop.f32.mrf.mxu1  ;;  %v1585_v53 = vpop.f32.mrf.mxu0 }
 0x147   : > { %v1045_v58 = vadd.f32 %v1583_v35, %v933_v51  ;;  %v1510_v34 = vadd.f32 %v1509_v37, %v1508_v48  ;;  %v1586_v6 = vadd.f32 %v1585_v53, %v1584_v30 }
 0x148   : > { %v1511_v61 = vpop.f32.mrf.mxu1  ;;  %v1587_v63 = vpop.f32.mrf.mxu0 }
 0x149   : > { %v1355_v39 = vpack.c.bf16 %v1045_v58, %v1042_v56  ;;  %v938_v0 = vadd.f32 %v1510_v34, %v826_v60 }
 0x14a   : > { %v1512_v62 = vpop.f32.mrf.mxu1  ;;  %v1588_v40 = vpop.f32.mrf.mxu0 }
 0x14b   : > { %1376 = vst [vmem:[%s2039_s22 + $0x28] sm:$0xff] %v1355_v39   ;;  %v1513_v2 = vadd.f32 %v1512_v62, %v1511_v61  ;;  %v1589_v47 = vadd.f32 %v1588_v40, %v1587_v63  ;;  %v1050_v12 = vadd.f32 %v1586_v6, %v938_v0 }
 0x14c   : > { %v1514_v5 = vpop.f32.mrf.mxu1  ;;  %v1590_v3 = vpop.f32.mrf.mxu0 }
 0x14d   : > { %v941_v45 = vadd.f32 %v1513_v2, %v829_v42 }
 0x14e   : > { %v1515_v7 = vpop.f32.mrf.mxu1  ;;  %v1591_v9 = vpop.f32.mrf.mxu0 }
 0x14f   : > { %v1053_v13 = vadd.f32 %v1589_v47, %v941_v45  ;;  %v1516_v44 = vadd.f32 %v1515_v7, %v1514_v5  ;;  %v1592_v25 = vadd.f32 %v1591_v9, %v1590_v3 }
 0x150   : > { %v1517_v15 = vpop.f32.mrf.mxu1  ;;  %v1593_v18 = vpop.f32.mrf.mxu0 }
 0x151   : > { %v1360_v49 = vpack.c.bf16 %v1053_v13, %v1050_v12  ;;  %v946_v8 = vadd.f32 %v1516_v44, %v834_v19 }
 0x152   : > { %v1518_v20 = vpop.f32.mrf.mxu1  ;;  %v1594_v21 = vpop.f32.mrf.mxu0 }
 0x153   : > { %1377 = vst [vmem:[%s2039_s22 + $0x30] sm:$0xff] %v1360_v49   ;;  %v1519_v11 = vadd.f32 %v1518_v20, %v1517_v15  ;;  %v1595_v14 = vadd.f32 %v1594_v21, %v1593_v18  ;;  %v1058_v28 = vadd.f32 %v1592_v25, %v946_v8 }
 0x154   : > { %v1520_v23 = vpop.f32.mrf.mxu1  ;;  %v1596_v24 = vpop.f32.mrf.mxu0 }
 0x155   : > { %v949_v26 = vadd.f32 %v1519_v11, %v837_v22 }
 0x156   : > { %v1521_v17 = vpop.f32.mrf.mxu1  ;;  %v1597_v27 = vpop.f32.mrf.mxu0 }
 0x157   : > { %v1061_v29 = vadd.f32 %v1595_v14, %v949_v26  ;;  %v1522_v54 = vadd.f32 %v1521_v17, %v1520_v23  ;;  %v1598_v57 = vadd.f32 %v1597_v27, %v1596_v24 }
 0x158   : > { %v1523_v31 = vpop.f32.mrf.mxu1  ;;  %v1599_v50 = vpop.f32.mrf.mxu0 }
 0x159   : > { %v1365_v52 = vpack.c.bf16 %v1061_v29, %v1058_v28  ;;  %v954_v59 = vadd.f32 %v1522_v54, %v2015_v4 }
 0x15a   : > { %v1524_v33 = vpop.f32.mrf.mxu1  ;;  %v1600_v36 = vpop.f32.mrf.mxu0 }
 0x15b   : > { %1378 = vst [vmem:[%s2039_s22 + $0x38] sm:$0xff] %v1365_v52   ;;  %v1525_v1 = vadd.f32 %v1524_v33, %v1523_v31  ;;  %v1601_v43 = vadd.f32 %v1600_v36, %v1599_v50  ;;  %v1066_v30 = vadd.f32 %v1598_v57, %v954_v59 }
 0x15c   : > { %v1526_v38 = vpop.f32.mrf.mxu1  ;;  %v1602_v55 = vpop.f32.mrf.mxu0 }
 0x15d   : > { %v957_v41 = vadd.f32 %v1525_v1, %v2022_v10 }
 0x15e   : > { %v1527_v46 = vpop.f32.mrf.mxu1  ;;  %v1603_v48 = vpop.f32.mrf.mxu0 }
 0x15f   : > { %v1069_v32 = vadd.f32 %v1601_v43, %v957_v41  ;;  %v1528_v51 = vadd.f32 %v1527_v46, %v1526_v38  ;;  %v1604_v4 = vadd.f32 %v1603_v48, %v1602_v55 }
 0x160   : > { %v1529_v35 = vpop.f32.mrf.mxu1  ;;  %v1605_v37 = vpop.f32.mrf.mxu0 }
 0x161   : > { %v1370_v53 = vpack.c.bf16 %v1069_v32, %v1066_v30  ;;  %v962_v56 = vadd.f32 %v1528_v51, %v2029_v16 }
 0x162   : > { %v1530_v58 = vpop.f32.mrf.mxu1  ;;  %v1606_v34 = vpop.f32.mrf.mxu0 }
 0x163   : > { %1379 = vst [vmem:[%s2039_s22 + $0x40] sm:$0xff] %v1370_v53   ;;  %v1074_v61 = vadd.f32 %v1604_v4, %v962_v56 }
 0x165   : > { %v1326_v63 = vpack.c.bf16 %v1074_v61, %v1074_v61 }
 0x167   : > { %1174 = vst [vmem:[%s2039_s22 + $0x48] sm:$0xf] %v1326_v63 }
 0x168 PF: > { %s13_s12 = sadd.s32 1, %s1687_s12  }
 0x169   : > { %p10_p4 = scmp.ge.s32.totalorder %s13_s12, 4  }
 0x16b   :  { %12 = sbr.rel (!%p10_p4) target bundleno = 1 (0x1), region = 62 }

</bundles_post_ra>
